<compile_context>
chip_gen: v7x
topology: tpu7x:2x2x1
jax: 0.10.0
libtpu: 0.0.40
codegen_flags: <defaults>
</compile_context>

<pallas_src>
import functools

import jax
import jax.numpy as jnp
from jax import lax
from jax.experimental import pallas as pl
from jax.experimental.pallas import tpu as pltpu


def _contracting_kernel(xe_ref, xo_ref, w_ref, out_ref, sum_ref, ssq_ref,
                        *, tile_ho, wo, n_tiles, eps):
    """One (batch, cout-tile, spatial-tile) grid step.

    xe_ref : (1, (Ho+1)*Wo, 3C) bf16  even padded rows, kw-folded, flattened
    xo_ref : (1,  Ho   *Wo, 3C) bf16  odd  padded rows, kw-folded, flattened
    w_ref  : (3, 3C, Tcout)     bf16  per-kh folded weights
    out_ref: (1, Ho*Wo, Tcout)        resident output block (raw conv stash,
                                      normalized + ReLU'd on the last tile)
    sum_ref/ssq_ref: (1, Tcout) f32   per-channel running statistics
    """
    j = pl.program_id(2)
    tcout = w_ref.shape[2]
    tp = tile_ho * wo                        # output pixels in this tile

    @pl.when(j == 0)
    def _init():
        sum_ref[...] = jnp.zeros_like(sum_ref)
        ssq_ref[...] = jnp.zeros_like(ssq_ref)

    row0 = j * tile_ho                       # first output row of this tile

    # kh -> (row-parity plane, row offset).  Columns are already folded, so
    # each tap is one contiguous (tp, 3C) slab starting at a multiple of Wo.
    taps = ((xe_ref, 0), (xo_ref, 0), (xe_ref, 1))
    acc = jnp.zeros((tp, tcout), jnp.float32)
    for k, (ref, oh) in enumerate(taps):
        start = pl.multiple_of((row0 + oh) * wo, wo)
        patches = ref[0, pl.ds(start, tp), :]              # (tp, 3C) bf16
        acc += jnp.dot(patches, w_ref[k],
                       preferred_element_type=jnp.float32)

    # Stash the raw conv output in the spatially-resident output block.
    # (No bias add: the affine=False InstanceNorm cancels a per-channel
    # constant exactly.)
    off = pl.multiple_of(j * tp, tp)
    out_ref[0, pl.ds(off, tp), :] = acc.astype(out_ref.dtype)

    # Fused single-pass per-channel partial statistics for InstanceNorm.
    # TODO(synk): switch to per-tile mean-shifted accumulation (or Welford)
    # if the E[x^2]-E[x]^2 cancellation ever matters at tighter tolerances.
    sum_ref[...] += jnp.sum(acc, axis=0, keepdims=True)
    ssq_ref[...] += jnp.sum(acc * acc, axis=0, keepdims=True)

    @pl.when(j == n_tiles - 1)
    def _finalize():
        inv_p = 1.0 / float(n_tiles * tp)
        mean = sum_ref[...] * inv_p                          # (1, Tcout)
        var = jnp.maximum(ssq_ref[...] * inv_p - mean * mean, 0.0)
        inv = lax.rsqrt(var + eps)

        def body(t, carry):
            o = pl.multiple_of(t * tp, tp)
            blk = out_ref[0, pl.ds(o, tp), :].astype(jnp.float32)
            out_ref[0, pl.ds(o, tp), :] = jnp.maximum(
                (blk - mean) * inv, 0.0).astype(out_ref.dtype)
            return carry

        # Fully unrolled: n_tiles is static, and a non-unrolled serial tail
        # would delay the single large output writeback DMA.
        lax.fori_loop(0, n_tiles, body, 0, unroll=True)


def _default_vmem_limit_bytes():
    """75% of physical VMEM (capped at 100 MiB); 48 MiB fallback (above the
    16/32 MiB scoped defaults, safely under v7x's 64 MiB physical VMEM)."""
    try:
        cap = int(pltpu.get_tpu_info().vmem_capacity_bytes)
        return min(cap * 3 // 4, 100 * 1024 * 1024)
    except Exception:
        return 48 * 1024 * 1024


def contracting_block(x, weight, bias=None, *, tile_ho=None, tile_cout=None,
                      eps=1e-5, out_dtype=jnp.float32, max_tile_px=8192):
    """ContractingBlock forward (default config: use_bn=True, ReLU).

    x: (N, C, H, W) f32 (H, W even); weight: (2C, C, 3, 3); bias: (2C,)
    (unused: the affine=False InstanceNorm that follows cancels a per-channel
    constant bias exactly).  Returns (N, 2C, H//2, W//2) in out_dtype.
    """
    del bias
    n, c, h, w = x.shape
    cout, cin, kh, kw = weight.shape
    assert cin == c and kh == 3 and kw == 3
    assert h % 2 == 0 and w % 2 == 0
    ho, wo = h // 2, w // 2
    p = ho * wo

    # NCHW -> NHWC (channels on the lane axis) + reflect pad by 1.
    # TODO(synk): a channels-last network would let both wrapper transposes
    # (here and at the end) and this padded copy be dropped entirely.
    xp = jnp.pad(jnp.transpose(x, (0, 2, 3, 1)),
                 ((0, 0), (1, 1), (1, 1), (0, 0)), mode="reflect")

    # Row-parity split + kw fold: for each output column the three kw taps
    # are concatenated along channels (channel index = kw*C + cin), then the
    # (row, col) axes are flattened so in-kernel slices need no reshape and
    # always start at a multiple of Wo.  bf16 cast fused into the same copy.
    bf = jnp.bfloat16

    def fold_cols(rows):                      # rows: (N, R, 2*Wo+2, C)
        return jnp.concatenate(
            [rows[:, :, 0:2 * wo:2, :],       # kw = 0 -> padded col 2j
             rows[:, :, 1:2 * wo:2, :],       # kw = 1 -> padded col 2j+1
             rows[:, :, 2:2 * wo + 1:2, :]],  # kw = 2 -> padded col 2j+2
            axis=-1)

    x_even = fold_cols(xp[:, 0:2 * ho + 1:2]).astype(bf)   # (N, Ho+1, Wo, 3C)
    x_odd = fold_cols(xp[:, 1:2 * ho:2]).astype(bf)        # (N, Ho,   Wo, 3C)
    x_even = x_even.reshape(n, (ho + 1) * wo, 3 * c)
    x_odd = x_odd.reshape(n, ho * wo, 3 * c)

    # weight (Cout, C, 3, 3) -> (3, 3C, Cout): index kh, row index kw*C + cin
    # (matches the fold_cols channel order).
    w_taps = jnp.transpose(weight, (2, 3, 1, 0)).reshape(3, 3 * c, cout)
    w_taps = w_taps.astype(bf)

    # Spatial row-tile: largest divisor of Ho keeping <= max_tile_px output
    # pixels per tile (larger tiles amortize the ~0.35 us grid-step overhead
    # and grow matmul M).  Wo a multiple of 8 keeps slice starts sublane
    # aligned.  TODO(synk): prime Ho degenerates to tile_ho=1; a masked last
    # tile (pl.cdiv grid) would be needed to do better there.
    if tile_ho is None:
        tile_ho = 1
        for d in range(ho, 0, -1):
            if ho % d == 0 and d * wo <= max_tile_px:
                tile_ho = d
                break
    assert ho % tile_ho == 0
    n_tiles = ho // tile_ho

    # Cout tile: feeds v7x's second TensorCore when the batch axis is
    # degenerate (CycleGAN typically runs N == 1) and halves the resident
    # output block.  Tiles must stay lane-dense (multiple of 128) or full.
    if tile_cout is None:
        tile_cout = cout // 2 if (n == 1 and cout % 256 == 0) else cout
    assert cout % tile_cout == 0
    assert tile_cout == cout or tile_cout % 128 == 0
    n_cout_tiles = cout // tile_cout

    kernel = functools.partial(_contracting_kernel, tile_ho=tile_ho, wo=wo,
                               n_tiles=n_tiles, eps=eps)

    out = pl.pallas_call(
        kernel,
        out_shape=jax.ShapeDtypeStruct((n, p, cout), out_dtype),
        grid_spec=pltpu.PrefetchScalarGridSpec(
            num_scalar_prefetch=0,
            grid=(n, n_cout_tiles, n_tiles),
            in_specs=[
                pl.BlockSpec((1, (ho + 1) * wo, 3 * c),
                             lambda i, co, j: (i, 0, 0)),
                pl.BlockSpec((1, ho * wo, 3 * c),
                             lambda i, co, j: (i, 0, 0)),
                pl.BlockSpec((3, 3 * c, tile_cout),
                             lambda i, co, j: (0, 0, co)),
            ],
            out_specs=pl.BlockSpec((1, p, tile_cout),
                                   lambda i, co, j: (i, 0, co)),
            scratch_shapes=[pltpu.VMEM((1, tile_cout), jnp.float32),
                            pltpu.VMEM((1, tile_cout), jnp.float32)],
        ),
        compiler_params=pltpu.CompilerParams(
            # The spatial-tile axis must stay "arbitrary": it accumulates the
            # InstanceNorm statistics in scratch and defers normalization.
            dimension_semantics=("parallel", "parallel", "arbitrary"),
            vmem_limit_bytes=_default_vmem_limit_bytes(),
        ),
    )(x_even, x_odd, w_taps)

    # (N, P, Cout) -> (N, Cout, Ho, Wo) once, in the wrapper.
    return jnp.transpose(out, (0, 2, 1)).reshape(n, cout, ho, wo)


def _reference(x, weight, bias):
    """Pure-JAX reference of the PyTorch forward (bias included)."""
    xp = jnp.pad(x, ((0, 0), (0, 0), (1, 1), (1, 1)), mode="reflect")
    y = lax.conv_general_dilated(
        xp, weight, window_strides=(2, 2), padding="VALID",
        dimension_numbers=("NCHW", "OIHW", "NCHW"))
    y = y + bias[None, :, None, None]
    mean = jnp.mean(y, axis=(2, 3), keepdims=True)
    var = jnp.mean((y - mean) ** 2, axis=(2, 3), keepdims=True)
    y = (y - mean) * lax.rsqrt(var + 1e-5)
    return jnp.maximum(y, 0.0)


if __name__ == "__main__":
    key = jax.random.PRNGKey(0)
    kx, kwt, kb = jax.random.split(key, 3)

    N, C, H, W = 2, 4, 16, 16
    Cout = 2 * C

    x = jax.random.normal(kx, (N, C, H, W), dtype=jnp.float32)
    fan_in = C * 3 * 3
    bound = 1.0 / (fan_in ** 0.5)
    weight = jax.random.uniform(kwt, (Cout, C, 3, 3), minval=-bound,
                                maxval=bound, dtype=jnp.float32)
    bias = jax.random.uniform(kb, (Cout,), minval=-bound, maxval=bound,
                              dtype=jnp.float32)

    ref = jax.block_until_ready(_reference(x, weight, bias))

    # tile_ho=4 -> 2 spatial tiles per sample: exercises the cross-tile
    # sum/sumsq accumulation + deferred full-extent normalization path.
    out_tiled = jax.block_until_ready(
        contracting_block(x, weight, bias, tile_ho=4))
    # Default tiling (single spatial tile at this toy size).
    out_full = jax.block_until_ready(contracting_block(x, weight, bias))

    assert out_tiled.shape == (N, Cout, H // 2, W // 2), out_tiled.shape
    assert out_full.shape == (N, Cout, H // 2, W // 2), out_full.shape
    # bf16 matmul operands (f32 accumulation): tolerance loosened vs pure f32.
    for out in (out_tiled, out_full):
        assert jnp.allclose(out, ref, atol=5e-2, rtol=5e-2), (
            "max abs diff = %f" % float(jnp.max(jnp.abs(out - ref))))
    print("KERNEL_OK")
</pallas_src>

<mosaic_0001>
module attributes {stable_mosaic.version = 11 : i64} {
  func.func @_contracting_kernel(%arg0: i32, %arg1: i32, %arg2: i32, %arg3: memref<1x72x12xbf16, #tpu.memory_space<vmem>>, %arg4: memref<1x64x12xbf16, #tpu.memory_space<vmem>>, %arg5: memref<3x12x8xbf16, #tpu.memory_space<vmem>>, %arg6: memref<1x64x8xf32, #tpu.memory_space<vmem>>, %arg7: memref<1x8xf32, #tpu.memory_space<vmem>>, %arg8: memref<1x8xf32, #tpu.memory_space<vmem>>) attributes {dimension_semantics = [#tpu.dimension_semantics<parallel>, #tpu.dimension_semantics<parallel>, #tpu.dimension_semantics<arbitrary>], iteration_bounds = array<i64: 2, 1, 2>, scalar_prefetch = 0 : i64, scratch_operands = 2 : i64, tpu.core_type = #tpu.core_type<tc>, window_params = [{transform_indices = @transform_0, window_bounds = array<i64: 1, 72, 12>}, {transform_indices = @transform_1, window_bounds = array<i64: 1, 64, 12>}, {transform_indices = @transform_2, window_bounds = array<i64: 3, 12, 8>}, {transform_indices = @transform_3, window_bounds = array<i64: 1, 64, 8>}]} {
    %c0_i32 = arith.constant 0 : i32
    %0 = arith.cmpi eq, %arg2, %c0_i32 : i32
    %1 = arith.extui %0 : i1 to i32
    %c0_i32_0 = arith.constant 0 : i32
    %2 = arith.cmpi ne, %1, %c0_i32_0 : i32
    scf.if %2 {
      %cst_34 = arith.constant 0.000000e+00 : f32
      %55 = vector.broadcast %cst_34 : f32 to vector<1x8xf32>
      %c0_35 = arith.constant 0 : index
      %c0_36 = arith.constant 0 : index
      %56 = vector.load %arg7[%c0_35, %c0_36] : memref<1x8xf32, #tpu.memory_space<vmem>>, vector<1x8xf32>
      tpu.vector_store %arg7[%c0_35, %c0_36], %55 {strides = array<i32>} : memref<1x8xf32, #tpu.memory_space<vmem>>, vector<1x8xf32>,
      %cst_37 = arith.constant 0.000000e+00 : f32
      %57 = vector.broadcast %cst_37 : f32 to vector<1x8xf32>
      %c0_38 = arith.constant 0 : index
      %c0_39 = arith.constant 0 : index
      %58 = vector.load %arg8[%c0_38, %c0_39] : memref<1x8xf32, #tpu.memory_space<vmem>>, vector<1x8xf32>
      tpu.vector_store %arg8[%c0_38, %c0_39], %57 {strides = array<i32>} : memref<1x8xf32, #tpu.memory_space<vmem>>, vector<1x8xf32>,
    } else {
    }
    %c4_i32 = arith.constant 4 : i32
    %3 = arith.muli %arg2, %c4_i32 : i32
    %cst = arith.constant 0.000000e+00 : f32
    %4 = vector.broadcast %cst : f32 to vector<32x8xf32>
    %c0_i32_1 = arith.constant 0 : i32
    %5 = arith.addi %3, %c0_i32_1 : i32
    %c8_i32 = arith.constant 8 : i32
    %6 = arith.muli %5, %c8_i32 : i32
    %7 = tpu.assume_multiple %6, 8 : i32
    %c0 = arith.constant 0 : index
    %8 = arith.index_cast %7 : i32 to index
    %c0_2 = arith.constant 0 : index
    %9 = vector.load %arg3[%c0, %8, %c0_2] : memref<1x72x12xbf16, #tpu.memory_space<vmem>>, vector<1x32x12xbf16>
    %10 = vector.shape_cast %9 : vector<1x32x12xbf16> to vector<32x12xbf16>
    %c0_3 = arith.constant 0 : index
    %c0_4 = arith.constant 0 : index
    %c0_5 = arith.constant 0 : index
    %11 = vector.load %arg5[%c0_3, %c0_4, %c0_5] : memref<3x12x8xbf16, #tpu.memory_space<vmem>>, vector<1x12x8xbf16>
    %12 = vector.shape_cast %11 : vector<1x12x8xbf16> to vector<12x8xbf16>
    %cst_6 = arith.constant dense<0.000000e+00> : vector<32x8xf32>
    %13 = tpu.matmul %10, %12, %cst_6 {dimension_numbers = #tpu.dot_dimension_numbers<[1], [0], [0], [1], [0, 0, 1, 1], [], []>} : vector<32x12xbf16>, vector<12x8xbf16>, vector<32x8xf32> -> vector<32x8xf32>
    %14 = arith.addf %4, %13 : vector<32x8xf32>
    %c0_i32_7 = arith.constant 0 : i32
    %15 = arith.addi %3, %c0_i32_7 : i32
    %c8_i32_8 = arith.constant 8 : i32
    %16 = arith.muli %15, %c8_i32_8 : i32
    %17 = tpu.assume_multiple %16, 8 : i32
    %c0_9 = arith.constant 0 : index
    %18 = arith.index_cast %17 : i32 to index
    %c0_10 = arith.constant 0 : index
    %19 = vector.load %arg4[%c0_9, %18, %c0_10] : memref<1x64x12xbf16, #tpu.memory_space<vmem>>, vector<1x32x12xbf16>
    %20 = vector.shape_cast %19 : vector<1x32x12xbf16> to vector<32x12xbf16>
    %c1 = arith.constant 1 : index
    %c0_11 = arith.constant 0 : index
    %c0_12 = arith.constant 0 : index
    %21 = vector.load %arg5[%c1, %c0_11, %c0_12] : memref<3x12x8xbf16, #tpu.memory_space<vmem>>, vector<1x12x8xbf16>
    %22 = vector.shape_cast %21 : vector<1x12x8xbf16> to vector<12x8xbf16>
    %cst_13 = arith.constant dense<0.000000e+00> : vector<32x8xf32>
    %23 = tpu.matmul %20, %22, %cst_13 {dimension_numbers = #tpu.dot_dimension_numbers<[1], [0], [0], [1], [0, 0, 1, 1], [], []>} : vector<32x12xbf16>, vector<12x8xbf16>, vector<32x8xf32> -> vector<32x8xf32>
    %24 = arith.addf %14, %23 : vector<32x8xf32>
    %c1_i32 = arith.constant 1 : i32
    %25 = arith.addi %3, %c1_i32 : i32
    %c8_i32_14 = arith.constant 8 : i32
    %26 = arith.muli %25, %c8_i32_14 : i32
    %27 = tpu.assume_multiple %26, 8 : i32
    %c0_15 = arith.constant 0 : index
    %28 = arith.index_cast %27 : i32 to index
    %c0_16 = arith.constant 0 : index
    %29 = vector.load %arg3[%c0_15, %28, %c0_16] : memref<1x72x12xbf16, #tpu.memory_space<vmem>>, vector<1x32x12xbf16>
    %30 = vector.shape_cast %29 : vector<1x32x12xbf16> to vector<32x12xbf16>
    %c2 = arith.constant 2 : index
    %c0_17 = arith.constant 0 : index
    %c0_18 = arith.constant 0 : index
    %31 = vector.load %arg5[%c2, %c0_17, %c0_18] : memref<3x12x8xbf16, #tpu.memory_space<vmem>>, vector<1x12x8xbf16>
    %32 = vector.shape_cast %31 : vector<1x12x8xbf16> to vector<12x8xbf16>
    %cst_19 = arith.constant dense<0.000000e+00> : vector<32x8xf32>
    %33 = tpu.matmul %30, %32, %cst_19 {dimension_numbers = #tpu.dot_dimension_numbers<[1], [0], [0], [1], [0, 0, 1, 1], [], []>} : vector<32x12xbf16>, vector<12x8xbf16>, vector<32x8xf32> -> vector<32x8xf32>
    %34 = arith.addf %24, %33 : vector<32x8xf32>
    %c32_i32 = arith.constant 32 : i32
    %35 = arith.muli %arg2, %c32_i32 : i32
    %36 = tpu.assume_multiple %35, 32 : i32
    %c0_20 = arith.constant 0 : index
    %37 = arith.index_cast %36 : i32 to index
    %c0_21 = arith.constant 0 : index
    %38 = vector.load %arg6[%c0_20, %37, %c0_21] : memref<1x64x8xf32, #tpu.memory_space<vmem>>, vector<1x32x8xf32>
    %39 = vector.shape_cast %38 : vector<1x32x8xf32> to vector<32x8xf32>
    %40 = vector.shape_cast %34 : vector<32x8xf32> to vector<1x32x8xf32>
    tpu.vector_store %arg6[%c0_20, %37, %c0_21], %40 {strides = array<i32>} : memref<1x64x8xf32, #tpu.memory_space<vmem>>, vector<1x32x8xf32>,
    %c0_22 = arith.constant 0 : index
    %c0_23 = arith.constant 0 : index
    %41 = vector.load %arg7[%c0_22, %c0_23] : memref<1x8xf32, #tpu.memory_space<vmem>>, vector<1x8xf32>
    %cst_24 = arith.constant dense<0.000000e+00> : vector<8xf32>
    %42 = vector.multi_reduction <add>, %34, %cst_24 [0] : vector<32x8xf32> to vector<8xf32>
    %43 = vector.shape_cast %42 : vector<8xf32> to vector<1x8xf32>
    %44 = arith.addf %41, %43 : vector<1x8xf32>
    %c0_25 = arith.constant 0 : index
    %c0_26 = arith.constant 0 : index
    %45 = vector.load %arg7[%c0_25, %c0_26] : memref<1x8xf32, #tpu.memory_space<vmem>>, vector<1x8xf32>
    tpu.vector_store %arg7[%c0_25, %c0_26], %44 {strides = array<i32>} : memref<1x8xf32, #tpu.memory_space<vmem>>, vector<1x8xf32>,
    %c0_27 = arith.constant 0 : index
    %c0_28 = arith.constant 0 : index
    %46 = vector.load %arg8[%c0_27, %c0_28] : memref<1x8xf32, #tpu.memory_space<vmem>>, vector<1x8xf32>
    %47 = arith.mulf %34, %34 : vector<32x8xf32>
    %cst_29 = arith.constant dense<0.000000e+00> : vector<8xf32>
    %48 = vector.multi_reduction <add>, %47, %cst_29 [0] : vector<32x8xf32> to vector<8xf32>
    %49 = vector.shape_cast %48 : vector<8xf32> to vector<1x8xf32>
    %50 = arith.addf %46, %49 : vector<1x8xf32>
    %c0_30 = arith.constant 0 : index
    %c0_31 = arith.constant 0 : index
    %51 = vector.load %arg8[%c0_30, %c0_31] : memref<1x8xf32, #tpu.memory_space<vmem>>, vector<1x8xf32>
    tpu.vector_store %arg8[%c0_30, %c0_31], %50 {strides = array<i32>} : memref<1x8xf32, #tpu.memory_space<vmem>>, vector<1x8xf32>,
    %c1_i32_32 = arith.constant 1 : i32
    %52 = arith.cmpi eq, %arg2, %c1_i32_32 : i32
    %53 = arith.extui %52 : i1 to i32
    %c0_i32_33 = arith.constant 0 : i32
    %54 = arith.cmpi ne, %53, %c0_i32_33 : i32
    scf.if %54 {
      %c0_34 = arith.constant 0 : index
      %c0_35 = arith.constant 0 : index
      %55 = vector.load %arg7[%c0_34, %c0_35] : memref<1x8xf32, #tpu.memory_space<vmem>>, vector<1x8xf32>
      %cst_36 = arith.constant 1.562500e-02 : f32
      %56 = vector.broadcast %cst_36 : f32 to vector<1x8xf32>
      %57 = arith.mulf %55, %56 : vector<1x8xf32>
      %c0_37 = arith.constant 0 : index
      %c0_38 = arith.constant 0 : index
      %58 = vector.load %arg8[%c0_37, %c0_38] : memref<1x8xf32, #tpu.memory_space<vmem>>, vector<1x8xf32>
      %cst_39 = arith.constant 1.562500e-02 : f32
      %59 = vector.broadcast %cst_39 : f32 to vector<1x8xf32>
      %60 = arith.mulf %58, %59 : vector<1x8xf32>
      %61 = arith.mulf %57, %57 : vector<1x8xf32>
      %62 = arith.subf %60, %61 : vector<1x8xf32>
      %cst_40 = arith.constant 0.000000e+00 : f32
      %63 = vector.broadcast %cst_40 : f32 to vector<1x8xf32>
      %64 = arith.maximumf %62, %63 : vector<1x8xf32>
      %cst_41 = arith.constant 9.99999974E-6 : f32
      %65 = vector.broadcast %cst_41 : f32 to vector<1x8xf32>
      %66 = arith.addf %64, %65 : vector<1x8xf32>
      %67 = math.rsqrt %66 : vector<1x8xf32>
      %c0_i32_42 = arith.constant 0 : i32
      %c32_i32_43 = arith.constant 32 : i32
      %68 = arith.muli %c0_i32_42, %c32_i32_43 : i32
      %69 = tpu.assume_multiple %68, 32 : i32
      %c0_44 = arith.constant 0 : index
      %70 = arith.index_cast %69 : i32 to index
      %c0_45 = arith.constant 0 : index
      %71 = vector.load %arg6[%c0_44, %70, %c0_45] : memref<1x64x8xf32, #tpu.memory_space<vmem>>, vector<1x32x8xf32>
      %72 = vector.shape_cast %71 : vector<1x32x8xf32> to vector<32x8xf32>
      %73 = vector.broadcast %57 : vector<1x8xf32> to vector<32x8xf32>
      %74 = arith.subf %72, %73 : vector<32x8xf32>
      %75 = vector.broadcast %67 : vector<1x8xf32> to vector<32x8xf32>
      %76 = arith.mulf %74, %75 : vector<32x8xf32>
      %cst_46 = arith.constant 0.000000e+00 : f32
      %77 = vector.broadcast %cst_46 : f32 to vector<32x8xf32>
      %78 = arith.maximumf %76, %77 : vector<32x8xf32>
      %c0_47 = arith.constant 0 : index
      %79 = arith.index_cast %69 : i32 to index
      %c0_48 = arith.constant 0 : index
      %80 = vector.load %arg6[%c0_47, %79, %c0_48] : memref<1x64x8xf32, #tpu.memory_space<vmem>>, vector<1x32x8xf32>
      %81 = vector.shape_cast %80 : vector<1x32x8xf32> to vector<32x8xf32>
      %82 = vector.shape_cast %78 : vector<32x8xf32> to vector<1x32x8xf32>
      tpu.vector_store %arg6[%c0_47, %79, %c0_48], %82 {strides = array<i32>} : memref<1x64x8xf32, #tpu.memory_space<vmem>>, vector<1x32x8xf32>,
      %c1_i32_49 = arith.constant 1 : i32
      %c32_i32_50 = arith.constant 32 : i32
      %83 = arith.muli %c1_i32_49, %c32_i32_50 : i32
      %84 = tpu.assume_multiple %83, 32 : i32
      %c0_51 = arith.constant 0 : index
      %85 = arith.index_cast %84 : i32 to index
      %c0_52 = arith.constant 0 : index
      %86 = vector.load %arg6[%c0_51, %85, %c0_52] : memref<1x64x8xf32, #tpu.memory_space<vmem>>, vector<1x32x8xf32>
      %87 = vector.shape_cast %86 : vector<1x32x8xf32> to vector<32x8xf32>
      %88 = vector.broadcast %57 : vector<1x8xf32> to vector<32x8xf32>
      %89 = arith.subf %87, %88 : vector<32x8xf32>
      %90 = vector.broadcast %67 : vector<1x8xf32> to vector<32x8xf32>
      %91 = arith.mulf %89, %90 : vector<32x8xf32>
      %cst_53 = arith.constant 0.000000e+00 : f32
      %92 = vector.broadcast %cst_53 : f32 to vector<32x8xf32>
      %93 = arith.maximumf %91, %92 : vector<32x8xf32>
      %c0_54 = arith.constant 0 : index
      %94 = arith.index_cast %84 : i32 to index
      %c0_55 = arith.constant 0 : index
      %95 = vector.load %arg6[%c0_54, %94, %c0_55] : memref<1x64x8xf32, #tpu.memory_space<vmem>>, vector<1x32x8xf32>
      %96 = vector.shape_cast %95 : vector<1x32x8xf32> to vector<32x8xf32>
      %97 = vector.shape_cast %93 : vector<32x8xf32> to vector<1x32x8xf32>
      tpu.vector_store %arg6[%c0_54, %94, %c0_55], %97 {strides = array<i32>} : memref<1x64x8xf32, #tpu.memory_space<vmem>>, vector<1x32x8xf32>,
      %c2_i32 = arith.constant 2 : i32
    } else {
    }
    return
  }
  func.func @transform_0(%arg0: i32, %arg1: i32, %arg2: i32) -> (i32, i32, i32) {
    %c0_i32 = arith.constant 0 : i32
    %c0_i32_0 = arith.constant 0 : i32
    %c0_i32_1 = arith.constant 0 : i32
    return %arg0, %c0_i32, %c0_i32_0 : i32, i32, i32
  }
  func.func @transform_1(%arg0: i32, %arg1: i32, %arg2: i32) -> (i32, i32, i32) {
    %c0_i32 = arith.constant 0 : i32
    %c0_i32_0 = arith.constant 0 : i32
    %c0_i32_1 = arith.constant 0 : i32
    return %arg0, %c0_i32, %c0_i32_0 : i32, i32, i32
  }
  func.func @transform_2(%arg0: i32, %arg1: i32, %arg2: i32) -> (i32, i32, i32) {
    %c0_i32 = arith.constant 0 : i32
    %c0_i32_0 = arith.constant 0 : i32
    %c0_i32_1 = arith.constant 0 : i32
    return %c0_i32, %c0_i32_0, %arg1 : i32, i32, i32
  }
  func.func @transform_3(%arg0: i32, %arg1: i32, %arg2: i32) -> (i32, i32, i32) {
    %c0_i32 = arith.constant 0 : i32
    %c0_i32_0 = arith.constant 0 : i32
    return %arg0, %c0_i32, %arg1 : i32, i32, i32
  }
}

</mosaic_0001>

<bundles_post_ra>
// kernel: tpu_custom_call.1
= control target key start
LH: loop header
LB: loop body
LE: loop exit
PB: predicated region body
PF: predicated region fallthrough
CT: control target
= control target key end

     0   :  { %s935_s12 = smov 0   ;;  %s937_s13 = smov 0   ;;  %s1063_s0 = inlined_call_operand.vmem [shape: bf16[2,72,12], index: 0, kind: input, shape index: {}]   ;;  %s1064_s1 = inlined_call_operand.vmem [shape: bf16[2,64,12], index: 1, kind: input, shape index: {}]   ;;  %s1065_s2 = inlined_call_operand.vmem [shape: bf16[3,12,8], index: 2, kind: input, shape index: {}]   ;;  %s1066_s3 = inlined_call_operand.vmem [shape: f32[2,64,8], index: 3, kind: output, shape index: {}]  }
   0x1   :  { %s939_s14 = smov 0   ;;  %s941_s15 = smov 0  }
   0x2   :  { %s943_s16 = smov 0  }
   0x3 LB: > { %s25_s17 = sadd.s32 1, %s904_s14  ;;  %s32_s18 = sadd.s32 1, %s908_s15  ;;  %s912_s16 = sphi %s943_s16, %s13_s16   ;;  %s908_s15 = sphi %s941_s15, %s1070_s15   ;;  %s904_s14 = sphi %s939_s14, %s1069_s14   ;;  %s900_s13 = sphi %s937_s13, %s1068_s13   ;;  %s896_s12 = sphi %s935_s12, %s1067_s12  }
   0x4   : > { %p26_p0 = scmp.ge.s32.totalorder %s25_s17, 2  ;;  %p735_p1 = scmp.ge.s32.totalorder %s912_s16, 1 }
   0x5   : > { %p177_p2 = scmp.lt.s32.totalorder %s912_s16, 5 }
   0x6   : > { %s1072_s17 = smov (%p26_p0, %s25_s17), 0  ;;  %s1074_s18 = smov (!%p26_p0, %s32_s18), %s908_s15 }
   0x7   : > { %p178_p3 = pnand %p735_p1, %p177_p2  ;;  %p34_p4 = scmp.ge.s32.totalorder %s1074_s18, 2 }
   0x8   : > { %p213_p5 = scmp.lt.s32.totalorder (!%p178_p3), %s900_s13, 1  ;;  %p741_p6 = scmp.ne.s32.totalorder (!%p178_p3), %s896_s12, 0 }
   0x9   : > { %s1076_s18 = smov (%p34_p4, %s1074_s18), 0  ;;  %181 = sbr.rel (%p178_p3) target bundleno = 318 (0x13e), region = 32 }
  0x10   : > { %s1078_s13 = smov (!%p213_p5, %s900_s13), 1  ;;  %239 = sbr.rel (%p741_p6) target bundleno = 23 (0x17), region = 36 }
  0x11   : > { %s821_s19 = smul.u32 36, %s1078_s13  ;;  %s778_s20 = sshll.u32 %s1078_s13, 5  ;;  %vm240_vm0 = vcmask (!%p741_p6), 57344   ;;  %v914_v0 = vmov (!%p741_p6), 0.0  }
  0x12   : > { %s222_s23 = scalar_lea.vmem %s1064_s1, %s778_s20  ;;  %s779_s24 = sshll.u32 %s1078_s13, 6  ;;  %241 = vst.msk [vmem:[#allocation2] sm:$0x1] (!%p741_p6), %vm240_vm0, %v914_v0  ;;  %242 = vst.msk [vmem:[#allocation3] sm:$0x1] (!%p741_p6), %vm240_vm0, %v914_v0 }
  0x13   : > { %s973_s27 = scalar_lea.vmem %s1063_s0, %s821_s19  ;;  %s978_s30 = scalar_lea.vmem %s1066_s3, %s779_s24 }
  0x17 PF: > { %vm286_vm1 = vcmask 1045504   ;;  %s982_s4 = sshll.u32 %s896_s12, 5  ;;  %v863_v1 = vld [vmem:[%s1065_s2] sm:$0x3f]   ;;  %vm279_vm2 = vcmask 97280   ;;  %vm503_vm3 = vcmask 64512  }
  0x18   : > { %s245_s7 = sshra.s32 %s982_s4, 3  ;;  %s781_s8 = sadd.s32 8, %s982_s4  ;;  %819 = vmatprep.subr.msk.bf16.mxu0 %vm286_vm1, %v863_v1  ;;  %v361_v2 = vsel %vm286_vm1, %v863_v1, 0  ;;  %v865_v3 = vld [vmem:[%s1065_s2 + $0x10] sm:$0x3f]   ;;  %vm523_vm4 = vcmask 57344  }
  0x19   : > { %s744_s9 = sshll.u32 %s245_s7, 2  ;;  %s414_s10 = sshra.s32 %s781_s8, 3  ;;  %799 = vmatpush3.bf16.msra.mxu0 %v361_v2  ;;  %v447_v6 = vsel %vm286_vm1, %v865_v3, 0  ;;  %v867_v7 = vld [vmem:[%s1065_s2 + $0x8] sm:$0x3f]  }
  0x1a   : > { %s248_s11 = scalar_lea.vmem %s973_s27, %s744_s9  ;;  %s256_s20 = scalar_lea.vmem %s222_s23, %s744_s9  ;;  %820 = vmatprep.subr.msk.bf16.mxu0 %vm286_vm1, %v865_v3  ;;  %818 = vmatprep.subr.msk.bf16.mxu1 %vm286_vm1, %v867_v7  ;;  %v288_v9 = vsel %vm286_vm1, %v867_v7, 0  ;;  %v508_v52 = vld [vmem:[#allocation2] sm:$0x1]  ;;  %v525_v55 = vld [vmem:[#allocation3] sm:$0x1] }
  0x1b   : > { %v864_v4 = vld [vmem:[%s248_s11] sm:$0xff]   ;;  %s759_s21 = sshll.u32 %s414_s10, 2  ;;  %v866_v5 = vld [vmem:[%s248_s11 + $0x8] sm:$0xff]   ;;  %793 = vmatpush3.bf16.msra.mxu1 %v288_v9  ;;  %s502_s23 = scalar_lea.vmem %s978_s30, %s982_s4 }
  0x1c   : > { %800 = vmatprep.mubr.msk.bf16.mxu0 %vm279_vm2, %v864_v4  ;;  %s417_s25 = scalar_lea.vmem %s973_s27, %s759_s21  ;;  %v868_v8 = vld [vmem:[%s256_s20] sm:$0xff]   ;;  %v869_v10 = vld [vmem:[%s256_s20 + $0x8] sm:$0xff]   ;;  %p767_p7 = scmp.ne.s32.totalorder %s896_s12, 1 }
  0x1d   : > { %801 = vmatmul.mubr.msk.bf16.vlgmr.msra.gmra.mrb[0].mxu0 %vm279_vm2, %v866_v5  ;;  %794 = vmatprep.mubr.msk.bf16.mxu1 %vm279_vm2, %v868_v8  ;;  %v870_v11 = vld [vmem:[%s417_s25] sm:$0xff]   ;;  %v871_v12 = vld [vmem:[%s417_s25 + $0x8] sm:$0xff]   ;;  %v563_v0 = vlaneseq (!%p767_p7) }
  0x1e   : > { %805 = vmatpush3.bf16.msra.mxu0 %v447_v6  ;;  %806 = vmatprep.mubr.msk.bf16.mxu0 %vm279_vm2, %v870_v11 }
  0x1f   : > { %795 = vmatmul.mubr.msk.bf16.vlgmr.msra.gmra.mrb[0].mxu1 %vm279_vm2, %v869_v10  ;;  %v564_v3 = vshrl.u32 (!%p767_p7), %v563_v0, 7 }
  0x21   : > { %v565_v5 = vsub.s32 (!%p767_p7), 0, %v564_v3 }
  0x29   : > { %807 = vmatmul.mubr.msk.bf16.vlgmr.msra.gmra.mrb[0].mxu0 %vm279_vm2, %v871_v12 }
  0xf2   : > { %v796_v13 = vpop.f32.mrb[0].mxu1 }
  0xf3   : > { %v324_v14 = vpop.f32.mrb[1].mxu1 }
  0xf4   : > { %v797_v15 = vpop.f32.mrb[2].mxu1 }
  0xf5   : > { %v327_v16 = vpop.f32.mrb[3].mxu1 }
  0xfc   : > { %v808_v17 = vpop.f32.mrb[0].mxu0 }
  0xfd   : > { %v810_v18 = vadd.f32 %v808_v17, %v796_v13  ;;  %v483_v19 = vpop.f32.mrb[1].mxu0 }
  0xfe   : > { %v811_v20 = vadd.f32 %v483_v19, %v324_v14  ;;  %v809_v21 = vpop.f32.mrb[2].mxu0 }
  0xff   : > { %506 = vst.msk [vmem:[%s502_s23 + $0x10] sm:$0xff] %vm503_vm3, %v810_v18  ;;  %v812_v22 = vadd.f32 %v809_v21, %v797_v15  ;;  %v486_v23 = vpop.f32.mrb[3].mxu0  ;;  %v528_v26 = vmul.f32 %v810_v18, %v810_v18  ;;  %v512_v31 = vsel %vm503_vm3, %v810_v18, 0.0 }
 0x100   : > { %504 = vst.msk [vmem:[%s502_s23] sm:$0xff] %vm503_vm3, %v811_v20  ;;  %v526_v24 = vmul.f32 %v811_v20, %v811_v20  ;;  %v813_v25 = vadd.f32 %v486_v23, %v327_v16  ;;  %v509_v27 = vsel %vm503_vm3, %v811_v20, 0.0 }
 0x101   : > { %507 = vst.msk [vmem:[%s502_s23 + $0x18] sm:$0xff] %vm503_vm3, %v812_v22  ;;  %v529_v33 = vmul.f32 %v812_v22, %v812_v22  ;;  %v533_v37 = vsel %vm503_vm3, %v528_v26, 0.0  ;;  %v514_v38 = vsel %vm503_vm3, %v812_v22, 0.0 }
 0x102   : > { %505 = vst.msk [vmem:[%s502_s23 + $0x8] sm:$0xff] %vm503_vm3, %v813_v25  ;;  %v510_v28 = vsel %vm503_vm3, %v813_v25, 0.0  ;;  %v527_v29 = vmul.f32 %v813_v25, %v813_v25  ;;  %v530_v32 = vsel %vm503_vm3, %v526_v24, 0.0 }
 0x103   : > { %v511_v30 = vadd.f32 %v510_v28, %v509_v27  ;;  %v535_v41 = vsel %vm503_vm3, %v529_v33, 0.0 }
 0x104   : > { %v531_v34 = vsel %vm503_vm3, %v527_v29, 0.0 }
 0x105   : > { %v513_v35 = vadd.f32 %v512_v31, %v511_v30  ;;  %v532_v36 = vadd.f32 %v531_v34, %v530_v32 }
 0x107   : > { %v515_v39 = vadd.f32 %v514_v38, %v513_v35  ;;  %v534_v40 = vadd.f32 %v533_v37, %v532_v36 }
 0x109   : > { %v516_v42 = vrot.slane %v515_v39, 4  ;;  %v536_v43 = vadd.f32 %v535_v41, %v534_v40  ;;  %v558_v6 = vld [vmem:[%s978_s30] sm:$0xff] (!%p767_p7)  ;;  %v559_v8 = vld [vmem:[%s978_s30 + $0x8] sm:$0xff] (!%p767_p7)  ;;  %v560_v9 = vld [vmem:[%s978_s30 + $0x10] sm:$0xff] (!%p767_p7) }
 0x10a   : > { %v561_v10 = vld [vmem:[%s978_s30 + $0x18] sm:$0xff] (!%p767_p7)  ;;  %v768_v11 = vld [vmem:[%s978_s30 + $0x20] sm:$0xff] (!%p767_p7)  ;;  %v769_v12 = vld [vmem:[%s978_s30 + $0x28] sm:$0xff] (!%p767_p7) }
 0x10b   : > { %v517_v44 = vadd.f32 %v516_v42, %v515_v39  ;;  %v537_v45 = vrot.slane %v536_v43, 4  ;;  %v770_v13 = vld [vmem:[%s978_s30 + $0x30] sm:$0xff] (!%p767_p7)  ;;  %v771_v14 = vld [vmem:[%s978_s30 + $0x38] sm:$0xff] (!%p767_p7) }
 0x10d   : > { %v518_v46 = vrot.slane %v517_v44, 2  ;;  %v538_v47 = vadd.f32 %v537_v45, %v536_v43 }
 0x10f   : > { %v519_v48 = vadd.f32 %v518_v46, %v517_v44  ;;  %v539_v49 = vrot.slane %v538_v47, 2 }
 0x111   : > { %v520_v50 = vrot.slane %v519_v48, 1  ;;  %v540_v51 = vadd.f32 %v539_v49, %v538_v47 }
 0x113   : > { %v521_v53 = vadd.f32 %v520_v50, %v519_v48  ;;  %v541_v54 = vrot.slane %v540_v51, 1  ;;  %548 = sbr.rel (%p767_p7) target bundleno = 318 (0x13e), region = 40 }
 0x115   : > { %v522_v56 = vadd.f32 %v521_v53, %v508_v52  ;;  %v542_v57 = vadd.f32 %v541_v54, %v540_v51 }
 0x117   : > { %524 = vst.msk [vmem:[#allocation2] sm:$0x1] %vm523_vm4, %v522_v56  ;;  %v543_v58 = vadd.f32 %v542_v57, %v525_v55 }
 0x119   : > { %544 = vst.msk [vmem:[#allocation3] sm:$0x1] %vm523_vm4, %v543_v58 }
 0x11e   : > { %v549_v59 = vld [vmem:[#allocation2] sm:$0x1] }
 0x11f   : > { %v550_v61 = vmul.f32 0.015625, %v549_v59 }
 0x120   : > { %v551_v60 = vld [vmem:[#allocation3] sm:$0x1] }
 0x121   : > { %v552_v62 = vmul.f32 0.015625, %v551_v60  ;;  %v553_v63 = vmul.f32 %v550_v61, %v550_v61  ;;  %v566_v7 = vrot.slane %v550_v61, %v565_v5 }
 0x123   : > { %v554_v1 = vsub.f32 %v552_v62, %v553_v63  ;;  %v568_v15 = vsub.f32 %v558_v6, %v566_v7  ;;  %v569_v16 = vsub.f32 %v559_v8, %v566_v7  ;;  %v570_v17 = vsub.f32 %v560_v9, %v566_v7 }
 0x124   : > { %v571_v18 = vsub.f32 %v561_v10, %v566_v7  ;;  %v595_v20 = vsub.f32 %v768_v11, %v566_v7  ;;  %v596_v21 = vsub.f32 %v769_v12, %v566_v7  ;;  %v597_v22 = vsub.f32 %v770_v13, %v566_v7 }
 0x125   : > { %v555_v2 = vmax.f32 %v554_v1, 0.0  ;;  %v598_v23 = vsub.f32 %v771_v14, %v566_v7 }
 0x127   : > { %v556_v4 = vadd.f32 1e-05, %v555_v2 }
 0x129   : > { %872 = vrsqrt.f32 %v556_v4 }
 0x133   : > { %v873_v19 = vpop.eup %872 }
 0x134   : > { %v576_v24 = vrot.slane %v873_v19, %v565_v5 }
 0x136   : > { %v578_v25 = vmul.f32 %v576_v24, %v568_v15  ;;  %v579_v26 = vmul.f32 %v576_v24, %v569_v16  ;;  %v580_v27 = vmul.f32 %v576_v24, %v570_v17  ;;  %v581_v28 = vmul.f32 %v576_v24, %v571_v18 }
 0x137   : > { %v599_v29 = vmul.f32 %v595_v20, %v576_v24  ;;  %v600_v30 = vmul.f32 %v596_v21, %v576_v24  ;;  %v601_v31 = vmul.f32 %v597_v22, %v576_v24  ;;  %v602_v32 = vmul.f32 %v598_v23, %v576_v24 }
 0x138   : > { %v582_v33 = vmax.f32 %v578_v25, 0.0  ;;  %v583_v34 = vmax.f32 %v579_v26, 0.0  ;;  %v584_v35 = vmax.f32 %v580_v27, 0.0  ;;  %v585_v36 = vmax.f32 %v581_v28, 0.0 }
 0x139   : > { %v603_v37 = vmax.f32 %v599_v29, 0.0  ;;  %v604_v38 = vmax.f32 %v600_v30, 0.0  ;;  %v605_v39 = vmax.f32 %v601_v31, 0.0  ;;  %v606_v40 = vmax.f32 %v602_v32, 0.0 }
 0x13a   : > { %586 = vst.msk [vmem:[%s978_s30] sm:$0xff] %vm503_vm3, %v582_v33  ;;  %587 = vst.msk [vmem:[%s978_s30 + $0x8] sm:$0xff] %vm503_vm3, %v583_v34 }
 0x13b   : > { %588 = vst.msk [vmem:[%s978_s30 + $0x10] sm:$0xff] %vm503_vm3, %v584_v35  ;;  %589 = vst.msk [vmem:[%s978_s30 + $0x18] sm:$0xff] %vm503_vm3, %v585_v36 }
 0x13c   : > { %772 = vst.msk [vmem:[%s978_s30 + $0x20] sm:$0xff] %vm503_vm3, %v603_v37  ;;  %773 = vst.msk [vmem:[%s978_s30 + $0x28] sm:$0xff] %vm503_vm3, %v604_v38 }
 0x13d   : > { %774 = vst.msk [vmem:[%s978_s30 + $0x30] sm:$0xff] %vm503_vm3, %v605_v39  ;;  %775 = vst.msk [vmem:[%s978_s30 + $0x38] sm:$0xff] %vm503_vm3, %v606_v40 }
 0x13e PF: > { %s13_s16 = sadd.s32 1, %s912_s16   ;;  %s1067_s12 = smov %s904_s14 }
 0x13f   : > { %p10_p8 = scmp.ge.s32.totalorder %s13_s16, 6   ;;  %s1068_s13 = smov %s908_s15 }
 0x140   : > { %s1069_s14 = smov %s1072_s17  ;;  %s1070_s15 = smov %s1076_s18 }
 0x141   :  { %12 = sbr.rel (!%p10_p8) target bundleno = 3 (0x3), region = 83 }

</bundles_post_ra>
